<compile_context>
chip_gen: v5e
topology: v5e:2x2
jax: 0.10.0
libtpu: 0.0.40
codegen_flags: <defaults>
</compile_context>

<pallas_src>
import jax
import jax.numpy as jnp
from jax.experimental import pallas as pl
from jax.experimental.pallas import tpu as pltpu


_MAX_CONCURRENT_DMAS = 8


def _make_dma_clone_kernel(chunks):
    """Build a kernel body that copies in_hbm -> out_hbm with concurrent DMAs.

    `chunks` is a list of static (start, size) slices along axis 0, or None
    for a single whole-ref copy.
    """

    def kernel(in_hbm, out_hbm, sem):
        if chunks is None:
            copies = [pltpu.make_async_copy(in_hbm, out_hbm, sem.at[0])]
        else:
            copies = [
                pltpu.make_async_copy(
                    in_hbm.at[pl.ds(start, size)],
                    out_hbm.at[pl.ds(start, size)],
                    sem.at[k],
                )
                for k, (start, size) in enumerate(chunks)
            ]
        # Issue every DMA before waiting on any so multiple DMA engines can
        # stream HBM->HBM in parallel.
        for cp in copies:
            cp.start()
        for cp in copies:
            cp.wait()

    return kernel


def _hbm_clone(x):
    """Identity clone of `x` done as concurrent HBM->HBM DMAs (no VMEM staging)."""
    total_bytes = x.size * jnp.dtype(x.dtype).itemsize

    # Chunk only along a pure-major leading axis (ndim >= 3) so every slice is
    # a contiguous slab in the tiled HBM layout; otherwise one whole-ref DMA.
    if x.ndim >= 3 and x.shape[0] > 1:
        rows = x.shape[0]
        n_chunks = min(_MAX_CONCURRENT_DMAS, rows)
        base, rem = divmod(rows, n_chunks)
        chunks, start = [], 0
        for k in range(n_chunks):
            size = base + (1 if k < rem else 0)
            chunks.append((start, size))
            start += size
    else:
        n_chunks = 1
        chunks = None

    return pl.pallas_call(
        _make_dma_clone_kernel(chunks),
        out_shape=jax.ShapeDtypeStruct(x.shape, x.dtype),
        in_specs=[pl.BlockSpec(memory_space=pl.ANY)],
        out_specs=pl.BlockSpec(memory_space=pl.ANY),
        scratch_shapes=[pltpu.SemaphoreType.DMA((n_chunks,))],
        cost_estimate=pl.CostEstimate(
            flops=0, transcendentals=0, bytes_accessed=2 * total_bytes),
    )(x)


def test_all_forward(bx, by=None, target_bx=None, model=None,
                     epsilon=8.0 / 255, num_steps=10, step_size=2.0 / 255,
                     data_min=-1.0, data_max=1.0):
    """Pallas equivalent of Test_All.forward: returns a copy of bx.

    model / by / target_bx and the attack hyper-parameters are accepted for
    interface parity but (exactly as in the PyTorch forward) are unused.
    """
    orig_shape = bx.shape

    x = bx
    if bx.ndim > 3:
        # Merge leading (major) dims only: keeps the minor-two-dim tiled HBM
        # layout unchanged (free bitcast) while exposing more rows to split
        # across concurrent DMAs.
        lead = 1
        for d in orig_shape[:-2]:
            lead *= d
        x = bx.reshape((lead,) + tuple(orig_shape[-2:]))

    out = _hbm_clone(x)
    if out.shape != orig_shape:
        out = out.reshape(orig_shape)
    return out


if __name__ == "__main__":
    key = jax.random.PRNGKey(0)
    k_bx, k_by, k_tgt = jax.random.split(key, 3)

    # Small image-batch-like inputs: batch=2, channels=4, spatial=16x16,
    # values in [data_min, data_max] = [-1, 1].
    bx = jax.random.uniform(k_bx, (2, 4, 16, 16), dtype=jnp.float32,
                            minval=-1.0, maxval=1.0)
    by = jax.random.randint(k_by, (2,), 0, 10)
    target_bx = jax.random.uniform(k_tgt, (2, 4, 16, 16), dtype=jnp.float32,
                                   minval=-1.0, maxval=1.0)

    adv_bx = test_all_forward(bx, by, target_bx)
    adv_bx = jax.block_until_ready(adv_bx)

    # Correctness check against the reference semantics (identity clone).
    assert adv_bx.shape == bx.shape and adv_bx.dtype == bx.dtype
    assert bool(jnp.array_equal(adv_bx, bx))
    print("KERNEL_OK")
</pallas_src>

<mosaic_0001>
module attributes {stable_mosaic.version = 11 : i64} {
  func.func @kernel(%arg0: memref<8x16x16xf32, #tpu.memory_space<any>>, %arg1: memref<8x16x16xf32, #tpu.memory_space<any>>, %arg2: memref<8x!tpu.dma_semaphore, #tpu.memory_space<semaphore_mem>>) attributes {dimension_semantics = [], scalar_prefetch = 0 : i64, scratch_operands = 1 : i64, tpu.core_type = #tpu.core_type<tc>} {
    %c0_i32 = arith.constant 0 : i32
    %c0_i32_0 = arith.constant 0 : i32
    %c0_i32_1 = arith.constant 0 : i32
    %c0_i32_2 = arith.constant 0 : i32
    %0 = tpu.memref_slice %arg0[%c0_i32_0, %c0_i32_1, %c0_i32_2] : memref<8x16x16xf32, #tpu.memory_space<any>> -> memref<1x16x16xf32, #tpu.memory_space<any>>
    %c0_i32_3 = arith.constant 0 : i32
    %c0_i32_4 = arith.constant 0 : i32
    %c0_i32_5 = arith.constant 0 : i32
    %1 = tpu.memref_slice %arg1[%c0_i32_3, %c0_i32_4, %c0_i32_5] : memref<8x16x16xf32, #tpu.memory_space<any>> -> memref<1x16x16xf32, #tpu.memory_space<any>>
    %2 = tpu.memref_slice %arg2[%c0_i32] : memref<8x!tpu.dma_semaphore, #tpu.memory_space<semaphore_mem>> -> memref<1x!tpu.dma_semaphore, #tpu.memory_space<semaphore_mem>>
    %3 = tpu.memref_squeeze %2 : memref<1x!tpu.dma_semaphore, #tpu.memory_space<semaphore_mem>> -> memref<!tpu.dma_semaphore, #tpu.memory_space<semaphore_mem>>
    tpu.enqueue_dma source(%0 : memref<1x16x16xf32, #tpu.memory_space<any>>) target(%1 : memref<1x16x16xf32, #tpu.memory_space<any>>) target_semaphore(%3 : memref<!tpu.dma_semaphore, #tpu.memory_space<semaphore_mem>>)
    %c1_i32 = arith.constant 1 : i32
    %c1_i32_6 = arith.constant 1 : i32
    %c0_i32_7 = arith.constant 0 : i32
    %c0_i32_8 = arith.constant 0 : i32
    %4 = tpu.memref_slice %arg0[%c1_i32_6, %c0_i32_7, %c0_i32_8] : memref<8x16x16xf32, #tpu.memory_space<any>> -> memref<1x16x16xf32, #tpu.memory_space<any>>
    %c1_i32_9 = arith.constant 1 : i32
    %c0_i32_10 = arith.constant 0 : i32
    %c0_i32_11 = arith.constant 0 : i32
    %5 = tpu.memref_slice %arg1[%c1_i32_9, %c0_i32_10, %c0_i32_11] : memref<8x16x16xf32, #tpu.memory_space<any>> -> memref<1x16x16xf32, #tpu.memory_space<any>>
    %6 = tpu.memref_slice %arg2[%c1_i32] : memref<8x!tpu.dma_semaphore, #tpu.memory_space<semaphore_mem>> -> memref<1x!tpu.dma_semaphore, #tpu.memory_space<semaphore_mem>>
    %7 = tpu.memref_squeeze %6 : memref<1x!tpu.dma_semaphore, #tpu.memory_space<semaphore_mem>> -> memref<!tpu.dma_semaphore, #tpu.memory_space<semaphore_mem>>
    tpu.enqueue_dma source(%4 : memref<1x16x16xf32, #tpu.memory_space<any>>) target(%5 : memref<1x16x16xf32, #tpu.memory_space<any>>) target_semaphore(%7 : memref<!tpu.dma_semaphore, #tpu.memory_space<semaphore_mem>>)
    %c2_i32 = arith.constant 2 : i32
    %c2_i32_12 = arith.constant 2 : i32
    %c0_i32_13 = arith.constant 0 : i32
    %c0_i32_14 = arith.constant 0 : i32
    %8 = tpu.memref_slice %arg0[%c2_i32_12, %c0_i32_13, %c0_i32_14] : memref<8x16x16xf32, #tpu.memory_space<any>> -> memref<1x16x16xf32, #tpu.memory_space<any>>
    %c2_i32_15 = arith.constant 2 : i32
    %c0_i32_16 = arith.constant 0 : i32
    %c0_i32_17 = arith.constant 0 : i32
    %9 = tpu.memref_slice %arg1[%c2_i32_15, %c0_i32_16, %c0_i32_17] : memref<8x16x16xf32, #tpu.memory_space<any>> -> memref<1x16x16xf32, #tpu.memory_space<any>>
    %10 = tpu.memref_slice %arg2[%c2_i32] : memref<8x!tpu.dma_semaphore, #tpu.memory_space<semaphore_mem>> -> memref<1x!tpu.dma_semaphore, #tpu.memory_space<semaphore_mem>>
    %11 = tpu.memref_squeeze %10 : memref<1x!tpu.dma_semaphore, #tpu.memory_space<semaphore_mem>> -> memref<!tpu.dma_semaphore, #tpu.memory_space<semaphore_mem>>
    tpu.enqueue_dma source(%8 : memref<1x16x16xf32, #tpu.memory_space<any>>) target(%9 : memref<1x16x16xf32, #tpu.memory_space<any>>) target_semaphore(%11 : memref<!tpu.dma_semaphore, #tpu.memory_space<semaphore_mem>>)
    %c3_i32 = arith.constant 3 : i32
    %c3_i32_18 = arith.constant 3 : i32
    %c0_i32_19 = arith.constant 0 : i32
    %c0_i32_20 = arith.constant 0 : i32
    %12 = tpu.memref_slice %arg0[%c3_i32_18, %c0_i32_19, %c0_i32_20] : memref<8x16x16xf32, #tpu.memory_space<any>> -> memref<1x16x16xf32, #tpu.memory_space<any>>
    %c3_i32_21 = arith.constant 3 : i32
    %c0_i32_22 = arith.constant 0 : i32
    %c0_i32_23 = arith.constant 0 : i32
    %13 = tpu.memref_slice %arg1[%c3_i32_21, %c0_i32_22, %c0_i32_23] : memref<8x16x16xf32, #tpu.memory_space<any>> -> memref<1x16x16xf32, #tpu.memory_space<any>>
    %14 = tpu.memref_slice %arg2[%c3_i32] : memref<8x!tpu.dma_semaphore, #tpu.memory_space<semaphore_mem>> -> memref<1x!tpu.dma_semaphore, #tpu.memory_space<semaphore_mem>>
    %15 = tpu.memref_squeeze %14 : memref<1x!tpu.dma_semaphore, #tpu.memory_space<semaphore_mem>> -> memref<!tpu.dma_semaphore, #tpu.memory_space<semaphore_mem>>
    tpu.enqueue_dma source(%12 : memref<1x16x16xf32, #tpu.memory_space<any>>) target(%13 : memref<1x16x16xf32, #tpu.memory_space<any>>) target_semaphore(%15 : memref<!tpu.dma_semaphore, #tpu.memory_space<semaphore_mem>>)
    %c4_i32 = arith.constant 4 : i32
    %c4_i32_24 = arith.constant 4 : i32
    %c0_i32_25 = arith.constant 0 : i32
    %c0_i32_26 = arith.constant 0 : i32
    %16 = tpu.memref_slice %arg0[%c4_i32_24, %c0_i32_25, %c0_i32_26] : memref<8x16x16xf32, #tpu.memory_space<any>> -> memref<1x16x16xf32, #tpu.memory_space<any>>
    %c4_i32_27 = arith.constant 4 : i32
    %c0_i32_28 = arith.constant 0 : i32
    %c0_i32_29 = arith.constant 0 : i32
    %17 = tpu.memref_slice %arg1[%c4_i32_27, %c0_i32_28, %c0_i32_29] : memref<8x16x16xf32, #tpu.memory_space<any>> -> memref<1x16x16xf32, #tpu.memory_space<any>>
    %18 = tpu.memref_slice %arg2[%c4_i32] : memref<8x!tpu.dma_semaphore, #tpu.memory_space<semaphore_mem>> -> memref<1x!tpu.dma_semaphore, #tpu.memory_space<semaphore_mem>>
    %19 = tpu.memref_squeeze %18 : memref<1x!tpu.dma_semaphore, #tpu.memory_space<semaphore_mem>> -> memref<!tpu.dma_semaphore, #tpu.memory_space<semaphore_mem>>
    tpu.enqueue_dma source(%16 : memref<1x16x16xf32, #tpu.memory_space<any>>) target(%17 : memref<1x16x16xf32, #tpu.memory_space<any>>) target_semaphore(%19 : memref<!tpu.dma_semaphore, #tpu.memory_space<semaphore_mem>>)
    %c5_i32 = arith.constant 5 : i32
    %c5_i32_30 = arith.constant 5 : i32
    %c0_i32_31 = arith.constant 0 : i32
    %c0_i32_32 = arith.constant 0 : i32
    %20 = tpu.memref_slice %arg0[%c5_i32_30, %c0_i32_31, %c0_i32_32] : memref<8x16x16xf32, #tpu.memory_space<any>> -> memref<1x16x16xf32, #tpu.memory_space<any>>
    %c5_i32_33 = arith.constant 5 : i32
    %c0_i32_34 = arith.constant 0 : i32
    %c0_i32_35 = arith.constant 0 : i32
    %21 = tpu.memref_slice %arg1[%c5_i32_33, %c0_i32_34, %c0_i32_35] : memref<8x16x16xf32, #tpu.memory_space<any>> -> memref<1x16x16xf32, #tpu.memory_space<any>>
    %22 = tpu.memref_slice %arg2[%c5_i32] : memref<8x!tpu.dma_semaphore, #tpu.memory_space<semaphore_mem>> -> memref<1x!tpu.dma_semaphore, #tpu.memory_space<semaphore_mem>>
    %23 = tpu.memref_squeeze %22 : memref<1x!tpu.dma_semaphore, #tpu.memory_space<semaphore_mem>> -> memref<!tpu.dma_semaphore, #tpu.memory_space<semaphore_mem>>
    tpu.enqueue_dma source(%20 : memref<1x16x16xf32, #tpu.memory_space<any>>) target(%21 : memref<1x16x16xf32, #tpu.memory_space<any>>) target_semaphore(%23 : memref<!tpu.dma_semaphore, #tpu.memory_space<semaphore_mem>>)
    %c6_i32 = arith.constant 6 : i32
    %c6_i32_36 = arith.constant 6 : i32
    %c0_i32_37 = arith.constant 0 : i32
    %c0_i32_38 = arith.constant 0 : i32
    %24 = tpu.memref_slice %arg0[%c6_i32_36, %c0_i32_37, %c0_i32_38] : memref<8x16x16xf32, #tpu.memory_space<any>> -> memref<1x16x16xf32, #tpu.memory_space<any>>
    %c6_i32_39 = arith.constant 6 : i32
    %c0_i32_40 = arith.constant 0 : i32
    %c0_i32_41 = arith.constant 0 : i32
    %25 = tpu.memref_slice %arg1[%c6_i32_39, %c0_i32_40, %c0_i32_41] : memref<8x16x16xf32, #tpu.memory_space<any>> -> memref<1x16x16xf32, #tpu.memory_space<any>>
    %26 = tpu.memref_slice %arg2[%c6_i32] : memref<8x!tpu.dma_semaphore, #tpu.memory_space<semaphore_mem>> -> memref<1x!tpu.dma_semaphore, #tpu.memory_space<semaphore_mem>>
    %27 = tpu.memref_squeeze %26 : memref<1x!tpu.dma_semaphore, #tpu.memory_space<semaphore_mem>> -> memref<!tpu.dma_semaphore, #tpu.memory_space<semaphore_mem>>
    tpu.enqueue_dma source(%24 : memref<1x16x16xf32, #tpu.memory_space<any>>) target(%25 : memref<1x16x16xf32, #tpu.memory_space<any>>) target_semaphore(%27 : memref<!tpu.dma_semaphore, #tpu.memory_space<semaphore_mem>>)
    %c7_i32 = arith.constant 7 : i32
    %c7_i32_42 = arith.constant 7 : i32
    %c0_i32_43 = arith.constant 0 : i32
    %c0_i32_44 = arith.constant 0 : i32
    %28 = tpu.memref_slice %arg0[%c7_i32_42, %c0_i32_43, %c0_i32_44] : memref<8x16x16xf32, #tpu.memory_space<any>> -> memref<1x16x16xf32, #tpu.memory_space<any>>
    %c7_i32_45 = arith.constant 7 : i32
    %c0_i32_46 = arith.constant 0 : i32
    %c0_i32_47 = arith.constant 0 : i32
    %29 = tpu.memref_slice %arg1[%c7_i32_45, %c0_i32_46, %c0_i32_47] : memref<8x16x16xf32, #tpu.memory_space<any>> -> memref<1x16x16xf32, #tpu.memory_space<any>>
    %30 = tpu.memref_slice %arg2[%c7_i32] : memref<8x!tpu.dma_semaphore, #tpu.memory_space<semaphore_mem>> -> memref<1x!tpu.dma_semaphore, #tpu.memory_space<semaphore_mem>>
    %31 = tpu.memref_squeeze %30 : memref<1x!tpu.dma_semaphore, #tpu.memory_space<semaphore_mem>> -> memref<!tpu.dma_semaphore, #tpu.memory_space<semaphore_mem>>
    tpu.enqueue_dma source(%28 : memref<1x16x16xf32, #tpu.memory_space<any>>) target(%29 : memref<1x16x16xf32, #tpu.memory_space<any>>) target_semaphore(%31 : memref<!tpu.dma_semaphore, #tpu.memory_space<semaphore_mem>>)
    %c0_i32_48 = arith.constant 0 : i32
    %c0_i32_49 = arith.constant 0 : i32
    %c0_i32_50 = arith.constant 0 : i32
    %c0_i32_51 = arith.constant 0 : i32
    %32 = tpu.memref_slice %arg0[%c0_i32_49, %c0_i32_50, %c0_i32_51] : memref<8x16x16xf32, #tpu.memory_space<any>> -> memref<1x16x16xf32, #tpu.memory_space<any>>
    %c0_i32_52 = arith.constant 0 : i32
    %c0_i32_53 = arith.constant 0 : i32
    %c0_i32_54 = arith.constant 0 : i32
    %33 = tpu.memref_slice %arg1[%c0_i32_52, %c0_i32_53, %c0_i32_54] : memref<8x16x16xf32, #tpu.memory_space<any>> -> memref<1x16x16xf32, #tpu.memory_space<any>>
    %34 = tpu.memref_slice %arg2[%c0_i32_48] : memref<8x!tpu.dma_semaphore, #tpu.memory_space<semaphore_mem>> -> memref<1x!tpu.dma_semaphore, #tpu.memory_space<semaphore_mem>>
    %35 = tpu.memref_squeeze %34 : memref<1x!tpu.dma_semaphore, #tpu.memory_space<semaphore_mem>> -> memref<!tpu.dma_semaphore, #tpu.memory_space<semaphore_mem>>
    tpu.wait_dma2 semaphore(%35 : memref<!tpu.dma_semaphore, #tpu.memory_space<semaphore_mem>>) src(%32 : memref<1x16x16xf32, #tpu.memory_space<any>>) dst(%33 : memref<1x16x16xf32, #tpu.memory_space<any>>)
    %c1_i32_55 = arith.constant 1 : i32
    %c1_i32_56 = arith.constant 1 : i32
    %c0_i32_57 = arith.constant 0 : i32
    %c0_i32_58 = arith.constant 0 : i32
    %36 = tpu.memref_slice %arg0[%c1_i32_56, %c0_i32_57, %c0_i32_58] : memref<8x16x16xf32, #tpu.memory_space<any>> -> memref<1x16x16xf32, #tpu.memory_space<any>>
    %c1_i32_59 = arith.constant 1 : i32
    %c0_i32_60 = arith.constant 0 : i32
    %c0_i32_61 = arith.constant 0 : i32
    %37 = tpu.memref_slice %arg1[%c1_i32_59, %c0_i32_60, %c0_i32_61] : memref<8x16x16xf32, #tpu.memory_space<any>> -> memref<1x16x16xf32, #tpu.memory_space<any>>
    %38 = tpu.memref_slice %arg2[%c1_i32_55] : memref<8x!tpu.dma_semaphore, #tpu.memory_space<semaphore_mem>> -> memref<1x!tpu.dma_semaphore, #tpu.memory_space<semaphore_mem>>
    %39 = tpu.memref_squeeze %38 : memref<1x!tpu.dma_semaphore, #tpu.memory_space<semaphore_mem>> -> memref<!tpu.dma_semaphore, #tpu.memory_space<semaphore_mem>>
    tpu.wait_dma2 semaphore(%39 : memref<!tpu.dma_semaphore, #tpu.memory_space<semaphore_mem>>) src(%36 : memref<1x16x16xf32, #tpu.memory_space<any>>) dst(%37 : memref<1x16x16xf32, #tpu.memory_space<any>>)
    %c2_i32_62 = arith.constant 2 : i32
    %c2_i32_63 = arith.constant 2 : i32
    %c0_i32_64 = arith.constant 0 : i32
    %c0_i32_65 = arith.constant 0 : i32
    %40 = tpu.memref_slice %arg0[%c2_i32_63, %c0_i32_64, %c0_i32_65] : memref<8x16x16xf32, #tpu.memory_space<any>> -> memref<1x16x16xf32, #tpu.memory_space<any>>
    %c2_i32_66 = arith.constant 2 : i32
    %c0_i32_67 = arith.constant 0 : i32
    %c0_i32_68 = arith.constant 0 : i32
    %41 = tpu.memref_slice %arg1[%c2_i32_66, %c0_i32_67, %c0_i32_68] : memref<8x16x16xf32, #tpu.memory_space<any>> -> memref<1x16x16xf32, #tpu.memory_space<any>>
    %42 = tpu.memref_slice %arg2[%c2_i32_62] : memref<8x!tpu.dma_semaphore, #tpu.memory_space<semaphore_mem>> -> memref<1x!tpu.dma_semaphore, #tpu.memory_space<semaphore_mem>>
    %43 = tpu.memref_squeeze %42 : memref<1x!tpu.dma_semaphore, #tpu.memory_space<semaphore_mem>> -> memref<!tpu.dma_semaphore, #tpu.memory_space<semaphore_mem>>
    tpu.wait_dma2 semaphore(%43 : memref<!tpu.dma_semaphore, #tpu.memory_space<semaphore_mem>>) src(%40 : memref<1x16x16xf32, #tpu.memory_space<any>>) dst(%41 : memref<1x16x16xf32, #tpu.memory_space<any>>)
    %c3_i32_69 = arith.constant 3 : i32
    %c3_i32_70 = arith.constant 3 : i32
    %c0_i32_71 = arith.constant 0 : i32
    %c0_i32_72 = arith.constant 0 : i32
    %44 = tpu.memref_slice %arg0[%c3_i32_70, %c0_i32_71, %c0_i32_72] : memref<8x16x16xf32, #tpu.memory_space<any>> -> memref<1x16x16xf32, #tpu.memory_space<any>>
    %c3_i32_73 = arith.constant 3 : i32
    %c0_i32_74 = arith.constant 0 : i32
    %c0_i32_75 = arith.constant 0 : i32
    %45 = tpu.memref_slice %arg1[%c3_i32_73, %c0_i32_74, %c0_i32_75] : memref<8x16x16xf32, #tpu.memory_space<any>> -> memref<1x16x16xf32, #tpu.memory_space<any>>
    %46 = tpu.memref_slice %arg2[%c3_i32_69] : memref<8x!tpu.dma_semaphore, #tpu.memory_space<semaphore_mem>> -> memref<1x!tpu.dma_semaphore, #tpu.memory_space<semaphore_mem>>
    %47 = tpu.memref_squeeze %46 : memref<1x!tpu.dma_semaphore, #tpu.memory_space<semaphore_mem>> -> memref<!tpu.dma_semaphore, #tpu.memory_space<semaphore_mem>>
    tpu.wait_dma2 semaphore(%47 : memref<!tpu.dma_semaphore, #tpu.memory_space<semaphore_mem>>) src(%44 : memref<1x16x16xf32, #tpu.memory_space<any>>) dst(%45 : memref<1x16x16xf32, #tpu.memory_space<any>>)
    %c4_i32_76 = arith.constant 4 : i32
    %c4_i32_77 = arith.constant 4 : i32
    %c0_i32_78 = arith.constant 0 : i32
    %c0_i32_79 = arith.constant 0 : i32
    %48 = tpu.memref_slice %arg0[%c4_i32_77, %c0_i32_78, %c0_i32_79] : memref<8x16x16xf32, #tpu.memory_space<any>> -> memref<1x16x16xf32, #tpu.memory_space<any>>
    %c4_i32_80 = arith.constant 4 : i32
    %c0_i32_81 = arith.constant 0 : i32
    %c0_i32_82 = arith.constant 0 : i32
    %49 = tpu.memref_slice %arg1[%c4_i32_80, %c0_i32_81, %c0_i32_82] : memref<8x16x16xf32, #tpu.memory_space<any>> -> memref<1x16x16xf32, #tpu.memory_space<any>>
    %50 = tpu.memref_slice %arg2[%c4_i32_76] : memref<8x!tpu.dma_semaphore, #tpu.memory_space<semaphore_mem>> -> memref<1x!tpu.dma_semaphore, #tpu.memory_space<semaphore_mem>>
    %51 = tpu.memref_squeeze %50 : memref<1x!tpu.dma_semaphore, #tpu.memory_space<semaphore_mem>> -> memref<!tpu.dma_semaphore, #tpu.memory_space<semaphore_mem>>
    tpu.wait_dma2 semaphore(%51 : memref<!tpu.dma_semaphore, #tpu.memory_space<semaphore_mem>>) src(%48 : memref<1x16x16xf32, #tpu.memory_space<any>>) dst(%49 : memref<1x16x16xf32, #tpu.memory_space<any>>)
    %c5_i32_83 = arith.constant 5 : i32
    %c5_i32_84 = arith.constant 5 : i32
    %c0_i32_85 = arith.constant 0 : i32
    %c0_i32_86 = arith.constant 0 : i32
    %52 = tpu.memref_slice %arg0[%c5_i32_84, %c0_i32_85, %c0_i32_86] : memref<8x16x16xf32, #tpu.memory_space<any>> -> memref<1x16x16xf32, #tpu.memory_space<any>>
    %c5_i32_87 = arith.constant 5 : i32
    %c0_i32_88 = arith.constant 0 : i32
    %c0_i32_89 = arith.constant 0 : i32
    %53 = tpu.memref_slice %arg1[%c5_i32_87, %c0_i32_88, %c0_i32_89] : memref<8x16x16xf32, #tpu.memory_space<any>> -> memref<1x16x16xf32, #tpu.memory_space<any>>
    %54 = tpu.memref_slice %arg2[%c5_i32_83] : memref<8x!tpu.dma_semaphore, #tpu.memory_space<semaphore_mem>> -> memref<1x!tpu.dma_semaphore, #tpu.memory_space<semaphore_mem>>
    %55 = tpu.memref_squeeze %54 : memref<1x!tpu.dma_semaphore, #tpu.memory_space<semaphore_mem>> -> memref<!tpu.dma_semaphore, #tpu.memory_space<semaphore_mem>>
    tpu.wait_dma2 semaphore(%55 : memref<!tpu.dma_semaphore, #tpu.memory_space<semaphore_mem>>) src(%52 : memref<1x16x16xf32, #tpu.memory_space<any>>) dst(%53 : memref<1x16x16xf32, #tpu.memory_space<any>>)
    %c6_i32_90 = arith.constant 6 : i32
    %c6_i32_91 = arith.constant 6 : i32
    %c0_i32_92 = arith.constant 0 : i32
    %c0_i32_93 = arith.constant 0 : i32
    %56 = tpu.memref_slice %arg0[%c6_i32_91, %c0_i32_92, %c0_i32_93] : memref<8x16x16xf32, #tpu.memory_space<any>> -> memref<1x16x16xf32, #tpu.memory_space<any>>
    %c6_i32_94 = arith.constant 6 : i32
    %c0_i32_95 = arith.constant 0 : i32
    %c0_i32_96 = arith.constant 0 : i32
    %57 = tpu.memref_slice %arg1[%c6_i32_94, %c0_i32_95, %c0_i32_96] : memref<8x16x16xf32, #tpu.memory_space<any>> -> memref<1x16x16xf32, #tpu.memory_space<any>>
    %58 = tpu.memref_slice %arg2[%c6_i32_90] : memref<8x!tpu.dma_semaphore, #tpu.memory_space<semaphore_mem>> -> memref<1x!tpu.dma_semaphore, #tpu.memory_space<semaphore_mem>>
    %59 = tpu.memref_squeeze %58 : memref<1x!tpu.dma_semaphore, #tpu.memory_space<semaphore_mem>> -> memref<!tpu.dma_semaphore, #tpu.memory_space<semaphore_mem>>
    tpu.wait_dma2 semaphore(%59 : memref<!tpu.dma_semaphore, #tpu.memory_space<semaphore_mem>>) src(%56 : memref<1x16x16xf32, #tpu.memory_space<any>>) dst(%57 : memref<1x16x16xf32, #tpu.memory_space<any>>)
    %c7_i32_97 = arith.constant 7 : i32
    %c7_i32_98 = arith.constant 7 : i32
    %c0_i32_99 = arith.constant 0 : i32
    %c0_i32_100 = arith.constant 0 : i32
    %60 = tpu.memref_slice %arg0[%c7_i32_98, %c0_i32_99, %c0_i32_100] : memref<8x16x16xf32, #tpu.memory_space<any>> -> memref<1x16x16xf32, #tpu.memory_space<any>>
    %c7_i32_101 = arith.constant 7 : i32
    %c0_i32_102 = arith.constant 0 : i32
    %c0_i32_103 = arith.constant 0 : i32
    %61 = tpu.memref_slice %arg1[%c7_i32_101, %c0_i32_102, %c0_i32_103] : memref<8x16x16xf32, #tpu.memory_space<any>> -> memref<1x16x16xf32, #tpu.memory_space<any>>
    %62 = tpu.memref_slice %arg2[%c7_i32_97] : memref<8x!tpu.dma_semaphore, #tpu.memory_space<semaphore_mem>> -> memref<1x!tpu.dma_semaphore, #tpu.memory_space<semaphore_mem>>
    %63 = tpu.memref_squeeze %62 : memref<1x!tpu.dma_semaphore, #tpu.memory_space<semaphore_mem>> -> memref<!tpu.dma_semaphore, #tpu.memory_space<semaphore_mem>>
    tpu.wait_dma2 semaphore(%63 : memref<!tpu.dma_semaphore, #tpu.memory_space<semaphore_mem>>) src(%60 : memref<1x16x16xf32, #tpu.memory_space<any>>) dst(%61 : memref<1x16x16xf32, #tpu.memory_space<any>>)
    return
  }
}

</mosaic_0001>

<bundles_post_ra>
// kernel: tpu_custom_call.1
= control target key start
LH: loop header
LB: loop body
LE: loop exit
PB: predicated region body
PF: predicated region fallthrough
CT: control target
= control target key end

     0   :  { %s229_s15 = smov [#allocation2]   ;;  %s230_s16 = smov [#allocation3]   ;;  %s312_s0 = inlined_call_operand.hbm [shape: f32[8,16,16], index: 0, kind: input, shape index: {}]   ;;  %s313_s1 = inlined_call_operand.hbm [shape: f32[8,16,16], index: 1, kind: output, shape index: {}]  }
   0x1   :  { %s10_s8 = sshll.u32 %s312_s0, 4  ;;  %s12_s11 = sshll.u32 %s313_s1, 4  ;;  %s11_s8 = int_to_ptr.hbm [resolvable:$true] %s10_s8  ;;  %s13_s11 = int_to_ptr.hbm [resolvable:$true] %s12_s11 }
   0x2   :  { %s17_s14 = scalar_lea.hbm %s312_s0, 16  ;;  %s231_s17 = smov 0  }
   0x3   :  { %16 = dma.general %s11_s8, 256, %s13_s11, %s229_s15, %s230_s16, [#allocation4], %s231_s17, 0  }
   0x4   :  { %s18_s20 = scalar_lea.hbm %s313_s1, 16  ;;  %s24_s21 = sshll.u32 %s17_s14, 4  ;;  %s25_s21 = int_to_ptr.hbm [resolvable:$true] %s24_s21 }
   0x5   :  { %s26_s22 = sshll.u32 %s18_s20, 4  ;;  %s31_s25 = scalar_lea.hbm %s312_s0, 32  ;;  %s27_s22 = int_to_ptr.hbm [resolvable:$true] %s26_s22 }
   0x6   :  { %s232_s26 = smov [#allocation2 + $0x1]   ;;  %s233_s27 = smov [#allocation5]  }
   0x7   :  { %30 = dma.general %s25_s21, 256, %s27_s22, %s232_s26, %s233_s27, [#allocation6], %s231_s17, 0  }
   0x8   :  { %s32_s30 = scalar_lea.hbm %s313_s1, 32  ;;  %s38_s2 = sshll.u32 %s31_s25, 4  ;;  %s39_s2 = int_to_ptr.hbm [resolvable:$true] %s38_s2 }
   0x9   :  { %s40_s3 = sshll.u32 %s32_s30, 4  ;;  %s45_s6 = scalar_lea.hbm %s312_s0, 48  ;;  %s41_s3 = int_to_ptr.hbm [resolvable:$true] %s40_s3 }
   0xa   :  { %s234_s7 = smov [#allocation2 + $0x2]   ;;  %s235_s8 = smov [#allocation7]  }
   0xb   :  { %44 = dma.general %s39_s2, 256, %s41_s3, %s234_s7, %s235_s8, [#allocation8], %s231_s17, 0  }
   0xc   :  { %s46_s11 = scalar_lea.hbm %s313_s1, 48  ;;  %s52_s12 = sshll.u32 %s45_s6, 4  ;;  %s53_s12 = int_to_ptr.hbm [resolvable:$true] %s52_s12 }
   0xd   :  { %s54_s13 = sshll.u32 %s46_s11, 4  ;;  %s59_s16 = scalar_lea.hbm %s312_s0, 64  ;;  %s55_s13 = int_to_ptr.hbm [resolvable:$true] %s54_s13 }
   0xe   :  { %s236_s18 = smov [#allocation2 + $0x3]   ;;  %s237_s19 = smov [#allocation9]  }
   0xf   :  { %58 = dma.general %s53_s12, 256, %s55_s13, %s236_s18, %s237_s19, [#allocation10], %s231_s17, 0  }
  0x10   :  { %s60_s22 = scalar_lea.hbm %s313_s1, 64  ;;  %s66_s23 = sshll.u32 %s59_s16, 4  ;;  %s67_s23 = int_to_ptr.hbm [resolvable:$true] %s66_s23 }
  0x11   :  { %s68_s24 = sshll.u32 %s60_s22, 4  ;;  %s73_s27 = scalar_lea.hbm %s312_s0, 80  ;;  %s69_s24 = int_to_ptr.hbm [resolvable:$true] %s68_s24 }
  0x12   :  { %s238_s28 = smov [#allocation2 + $0x4]   ;;  %s239_s29 = smov [#allocation11]  }
  0x13   :  { %72 = dma.general %s67_s23, 256, %s69_s24, %s238_s28, %s239_s29, [#allocation12], %s231_s17, 0  }
  0x14   :  { %s74_s3 = scalar_lea.hbm %s313_s1, 80  ;;  %s80_s4 = sshll.u32 %s73_s27, 4  ;;  %s81_s4 = int_to_ptr.hbm [resolvable:$true] %s80_s4 }
  0x15   :  { %s82_s5 = sshll.u32 %s74_s3, 4  ;;  %s87_s8 = scalar_lea.hbm %s312_s0, 96  ;;  %s83_s5 = int_to_ptr.hbm [resolvable:$true] %s82_s5 }
  0x16   :  { %s240_s9 = smov [#allocation2 + $0x5]   ;;  %s241_s10 = smov [#allocation13]  }
  0x17   :  { %86 = dma.general %s81_s4, 256, %s83_s5, %s240_s9, %s241_s10, [#allocation14], %s231_s17, 0  }
  0x18   :  { %s88_s13 = scalar_lea.hbm %s313_s1, 96  ;;  %s94_s14 = sshll.u32 %s87_s8, 4  ;;  %s95_s14 = int_to_ptr.hbm [resolvable:$true] %s94_s14 }
  0x19   :  { %s96_s15 = sshll.u32 %s88_s13, 4  ;;  %s101_s19 = scalar_lea.hbm %s312_s0, 112  ;;  %s97_s15 = int_to_ptr.hbm [resolvable:$true] %s96_s15 }
  0x1a   :  { %s242_s20 = smov [#allocation2 + $0x6]   ;;  %s243_s21 = smov [#allocation15]  }
  0x1b   :  { %100 = dma.general %s95_s14, 256, %s97_s15, %s242_s20, %s243_s21, [#allocation16], %s231_s17, 0  }
  0x1c   :  { %s102_s24 = scalar_lea.hbm %s313_s1, 112  ;;  %s108_s25 = sshll.u32 %s101_s19, 4  ;;  %s109_s25 = int_to_ptr.hbm [resolvable:$true] %s108_s25 }
  0x1d   :  { %s110_s26 = sshll.u32 %s102_s24, 4  ;;  %s244_s27 = smov [#allocation2 + $0x7]   ;;  %s111_s26 = int_to_ptr.hbm [resolvable:$true] %s110_s26 }
  0x1e   :  { %s245_s28 = smov [#allocation17]  }
  0x1f   :  { %114 = dma.general %s109_s25, 256, %s111_s26, %s244_s27, %s245_s28, [#allocation18], %s231_s17, 0  }
  0x20   :  { %213 = dma.done.wait [#allocation2], 256 }
  0x21   :  { %214 = vsyncadd [#allocation2], 4294967040 }
  0x22   :  { %215 = dma.done.wait [#allocation2 + $0x1], 256 }
  0x23   :  { %216 = vsyncadd [#allocation2 + $0x1], 4294967040 }
  0x24   :  { %217 = dma.done.wait [#allocation2 + $0x2], 256 }
  0x25   :  { %218 = vsyncadd [#allocation2 + $0x2], 4294967040 }
  0x26   :  { %219 = dma.done.wait [#allocation2 + $0x3], 256 }
  0x27   :  { %220 = vsyncadd [#allocation2 + $0x3], 4294967040 }
  0x28   :  { %221 = dma.done.wait [#allocation2 + $0x4], 256 }
  0x29   :  { %222 = vsyncadd [#allocation2 + $0x4], 4294967040 }
  0x2a   :  { %223 = dma.done.wait [#allocation2 + $0x5], 256 }
  0x2b   :  { %224 = vsyncadd [#allocation2 + $0x5], 4294967040 }
  0x2c   :  { %225 = dma.done.wait [#allocation2 + $0x6], 256 }
  0x2d   :  { %226 = vsyncadd [#allocation2 + $0x6], 4294967040 }
  0x2e   :  { %227 = dma.done.wait [#allocation2 + $0x7], 256 }
  0x2f   :  { %228 = vsyncadd [#allocation2 + $0x7], 4294967040 }
  0x30   :  { %133 = vsyncmov [#allocation2] }
  0x33   :  { %s134_s0 = vpop.sfrf %133 }
  0x34   :  { %p188_p0 = scmp.ne.s32.totalorder %s134_s0, 0 }
  0x36   :  { %138 = shalt.err (%p188_p0)  }
  0x37   :  { %140 = vsyncmov [#allocation2 + $0x1] }
  0x3a   :  { %s141_s1 = vpop.sfrf %140 }
  0x3b   :  { %p189_p1 = scmp.ne.s32.totalorder %s141_s1, 0 }
  0x3d   :  { %145 = shalt.err (%p189_p1)  }
  0x3e   :  { %147 = vsyncmov [#allocation2 + $0x2] }
  0x41   :  { %s148_s17 = vpop.sfrf %147 }
  0x42   :  { %p190_p2 = scmp.ne.s32.totalorder %s148_s17, 0 }
  0x44   :  { %152 = shalt.err (%p190_p2)  }
  0x45   :  { %154 = vsyncmov [#allocation2 + $0x3] }
  0x48   :  { %s155_s29 = vpop.sfrf %154 }
  0x49   :  { %p191_p3 = scmp.ne.s32.totalorder %s155_s29, 0 }
  0x4b   :  { %159 = shalt.err (%p191_p3)  }
  0x4c   :  { %161 = vsyncmov [#allocation2 + $0x4] }
  0x4f   :  { %s162_s30 = vpop.sfrf %161 }
  0x50   :  { %p192_p4 = scmp.ne.s32.totalorder %s162_s30, 0 }
  0x52   :  { %166 = shalt.err (%p192_p4)  }
  0x53   :  { %168 = vsyncmov [#allocation2 + $0x5] }
  0x56   :  { %s169_s2 = vpop.sfrf %168 }
  0x57   :  { %p193_p5 = scmp.ne.s32.totalorder %s169_s2, 0 }
  0x59   :  { %173 = shalt.err (%p193_p5)  }
  0x5a   :  { %175 = vsyncmov [#allocation2 + $0x6] }
  0x5d   :  { %s176_s3 = vpop.sfrf %175 }
  0x5e   :  { %p194_p6 = scmp.ne.s32.totalorder %s176_s3, 0 }
  0x60   :  { %180 = shalt.err (%p194_p6)  }
  0x61   :  { %182 = vsyncmov [#allocation2 + $0x7] }
  0x64   :  { %s183_s4 = vpop.sfrf %182 }
  0x65   :  { %p195_p7 = scmp.ne.s32.totalorder %s183_s4, 0 }
  0x67   :  { %187 = shalt.err (%p195_p7)  }

</bundles_post_ra>
